<compile_context>
chip_gen: v5e
topology: v5e:2x2
jax: 0.10.0
libtpu: 0.0.40
codegen_flags: <defaults>
</compile_context>

<pallas_src>
import functools

import jax
import jax.numpy as jnp
from jax.experimental import pallas as pl
from jax.experimental.pallas import tpu as pltpu

# Geometry fixed by the PyTorch module: Linear(99, 2) requires conv1-out = 99, i.e. L = 201.
K = 5
STRIDE = 2
L = 201
L1 = (L - K) // STRIDE + 1        # 99
OUT = 2

# Padded, lane-friendly geometry.
LPAD = 256                        # 201 samples + 1 bias ("ones") column + zero pad
L1PAD = 128                       # conv output padded to a full lane group
OUTPAD = 128                      # lane-dense output; wrapper slices [:, :2]
TILE_M = 256                      # batch rows per grid step (multiple of 128 -> ok on v5e too)


def cnn_kernel(x_ref, a_ref, wt_ref, bfc_ref, o_ref):
    """Fused conv1(as matmul, bias folded) -> ReLU -> (1x1 conv folded) Linear."""
    # conv1 (stride 2, k=5) + b1, as one MXU matmul against the augmented Toeplitz matrix
    h = jnp.dot(x_ref[...], a_ref[...], preferred_element_type=jnp.float32)
    h = jnp.maximum(h, 0.0)                                              # ReLU
    # Linear(99 -> 2) with the 1x1 conv folded into wt/bias; lane-dense padded output
    o_ref[...] = jnp.dot(h, wt_ref[...], preferred_element_type=jnp.float32) + bfc_ref[...]


def make_params(w1, b1, w2, b2, w_fc, b_fc):
    """Build padded constant operands once (hoisted out of the per-call path)."""
    w1 = jnp.asarray(w1, jnp.float32).reshape(K)
    w_fc = jnp.asarray(w_fc, jnp.float32).reshape(OUT, L1)
    b_fc = jnp.asarray(b_fc, jnp.float32).reshape(OUT)
    b1 = jnp.asarray(b1, jnp.float32)
    w2 = jnp.asarray(w2, jnp.float32)
    b2 = jnp.asarray(b2, jnp.float32)

    # Stride-2 Toeplitz matrix of the 5-tap conv1 weight.
    rows = jnp.arange(L)[:, None]                   # (L, 1)
    cols = jnp.arange(L1)[None, :]                  # (1, L1)
    k_idx = rows - STRIDE * cols                    # tap index hitting (row, col)
    mask = (k_idx >= 0) & (k_idx < K)
    a = jnp.where(mask, w1[jnp.clip(k_idx, 0, K - 1)], 0.0)              # (L, L1)

    # Augment: row L (hit by the appended ones-column of x) carries the conv1 bias.
    a_aug = jnp.zeros((LPAD, L1PAD), jnp.float32)
    a_aug = a_aug.at[:L, :L1].set(a)
    a_aug = a_aug.at[L, :L1].set(b1)

    # Fold the 1x1 conv (scalar scale/bias) into the Linear layer.
    wt = w2 * w_fc.T                                                     # (99, 2)
    bias = b2 * jnp.sum(w_fc, axis=1) + b_fc                             # (2,)

    wt_pad = jnp.zeros((L1PAD, OUTPAD), jnp.float32).at[:L1, :OUT].set(wt)
    bfc_pad = jnp.zeros((1, OUTPAD), jnp.float32).at[0, :OUT].set(bias)
    return a_aug, wt_pad, bfc_pad


@jax.jit
def simple_1d_cnn(x_ncl, a_aug, wt_pad, bfc_pad):
    """x_ncl: (N, 1, L) float32 -> (N, 1, 2) float32 (matches PyTorch forward)."""
    n, c, l = x_ncl.shape
    assert c == 1, "Simple1DCNN has a single input channel"
    assert l == L and (L - K) % STRIDE == 0, "Linear(99, 2) requires input length 201"

    n_pad = ((n + TILE_M - 1) // TILE_M) * TILE_M
    x2d = x_ncl.reshape(n, L).astype(jnp.float32)
    x_pad = jnp.zeros((n_pad, LPAD), jnp.float32)
    x_pad = x_pad.at[:n, :L].set(x2d)
    x_pad = x_pad.at[:n, L].set(1.0)                 # ones column -> folds b1 into matmul 1

    grid = (n_pad // TILE_M,)
    flops = 2 * n_pad * (LPAD * L1PAD + L1PAD * OUTPAD)
    bytes_accessed = 4 * (x_pad.size + a_aug.size + wt_pad.size + bfc_pad.size
                          + n_pad * OUTPAD)

    out = pl.pallas_call(
        cnn_kernel,
        out_shape=jax.ShapeDtypeStruct((n_pad, OUTPAD), jnp.float32),
        grid=grid,
        in_specs=[
            pl.BlockSpec((TILE_M, LPAD), lambda i: (i, 0)),     # x tile (pipelined)
            pl.BlockSpec((LPAD, L1PAD), lambda i: (0, 0)),      # A_aug (resident)
            pl.BlockSpec((L1PAD, OUTPAD), lambda i: (0, 0)),    # wt'   (resident)
            pl.BlockSpec((1, OUTPAD), lambda i: (0, 0)),        # bias' (resident)
        ],
        out_specs=pl.BlockSpec((TILE_M, OUTPAD), lambda i: (i, 0)),
        compiler_params=pltpu.CompilerParams(dimension_semantics=("parallel",)),
        cost_estimate=pl.CostEstimate(flops=flops, transcendentals=0,
                                      bytes_accessed=bytes_accessed),
    )(x_pad, a_aug, wt_pad, bfc_pad)

    return out[:n, :OUT].reshape(n, 1, OUT)


def reference(x_ncl, w1, b1, w2, b2, w_fc, b_fc):
    """Plain-JAX reference reproducing the PyTorch forward exactly."""
    n = x_ncl.shape[0]
    x = x_ncl.reshape(n, L)
    idx = STRIDE * jnp.arange(L1)[:, None] + jnp.arange(K)[None, :]   # (L1, K)
    patches = x[:, idx]                                               # (n, L1, K)
    h = jnp.einsum("njk,k->nj", patches, w1) + b1
    h = jnp.maximum(h, 0.0)
    h = h * w2 + b2
    y = h @ w_fc.T + b_fc
    return y.reshape(n, 1, OUT)


if __name__ == "__main__":
    key = jax.random.PRNGKey(0)
    kx_small, kx_big, k1, k2, k3, k4, k5, k6 = jax.random.split(key, 8)

    # Deterministic synthetic parameters (shapes from the module's __init__).
    w1 = jax.random.normal(k1, (K,), dtype=jnp.float32) * 0.4       # conv1 weight (1,1,5)->(5,)
    b1 = jax.random.normal(k2, (), dtype=jnp.float32) * 0.1         # conv1 bias
    w2 = jax.random.normal(k3, (), dtype=jnp.float32) * 0.5         # conv2 (1x1) weight
    b2 = jax.random.normal(k4, (), dtype=jnp.float32) * 0.1         # conv2 bias
    w_fc = jax.random.normal(k5, (OUT, L1), dtype=jnp.float32) * 0.1  # Linear weight (2, 99)
    b_fc = jax.random.normal(k6, (OUT,), dtype=jnp.float32) * 0.1     # Linear bias (2,)

    params = make_params(w1, b1, w2, b2, w_fc, b_fc)   # built once, reused across calls

    # Small shape from the spec (N=2) and a batched shape exercising >1 grid tile.
    for kx, n in ((kx_small, 2), (kx_big, 384)):
        x = jax.random.normal(kx, (n, 1, L), dtype=jnp.float32)
        y = jax.block_until_ready(simple_1d_cnn(x, *params))
        y_ref = reference(x, w1, b1, w2, b2, w_fc, b_fc)
        assert y.shape == (n, 1, OUT)
        assert jnp.allclose(y, y_ref, atol=1e-4, rtol=1e-4), (n, y, y_ref)

    print("KERNEL_OK")
</pallas_src>

<mosaic_0001>
module attributes {stable_mosaic.version = 11 : i64} {
  func.func @cnn_kernel(%arg0: i32, %arg1: memref<256x256xf32, #tpu.memory_space<vmem>>, %arg2: memref<256x128xf32, #tpu.memory_space<vmem>>, %arg3: memref<128x128xf32, #tpu.memory_space<vmem>>, %arg4: memref<1x128xf32, #tpu.memory_space<vmem>>, %arg5: memref<256x128xf32, #tpu.memory_space<vmem>>) attributes {dimension_semantics = [#tpu.dimension_semantics<parallel>], iteration_bounds = array<i64: 1>, scalar_prefetch = 0 : i64, scratch_operands = 0 : i64, tpu.core_type = #tpu.core_type<tc>, window_params = [{transform_indices = @transform_0, window_bounds = array<i64: 256, 256>}, {pipeline_mode = #tpu.pipeline_mode<synchronous>, transform_indices = @transform_1, window_bounds = array<i64: 256, 128>}, {pipeline_mode = #tpu.pipeline_mode<synchronous>, transform_indices = @transform_2, window_bounds = array<i64: 128, 128>}, {pipeline_mode = #tpu.pipeline_mode<synchronous>, transform_indices = @transform_3, window_bounds = array<i64: 1, 128>}, {transform_indices = @transform_4, window_bounds = array<i64: 256, 128>}]} {
    %c0 = arith.constant 0 : index
    %c0_0 = arith.constant 0 : index
    %0 = vector.load %arg1[%c0, %c0_0] : memref<256x256xf32, #tpu.memory_space<vmem>>, vector<256x256xf32>
    %c0_1 = arith.constant 0 : index
    %c0_2 = arith.constant 0 : index
    %1 = vector.load %arg2[%c0_1, %c0_2] : memref<256x128xf32, #tpu.memory_space<vmem>>, vector<256x128xf32>
    %cst = arith.constant dense<0.000000e+00> : vector<256x128xf32>
    %2 = tpu.matmul %0, %1, %cst {dimension_numbers = #tpu.dot_dimension_numbers<[1], [0], [0], [1], [0, 0, 1, 1], [], []>} : vector<256x256xf32>, vector<256x128xf32>, vector<256x128xf32> -> vector<256x128xf32>
    %cst_3 = arith.constant 0.000000e+00 : f32
    %3 = vector.broadcast %cst_3 : f32 to vector<256x128xf32>
    %4 = arith.maximumf %2, %3 : vector<256x128xf32>
    %c0_4 = arith.constant 0 : index
    %c0_5 = arith.constant 0 : index
    %5 = vector.load %arg3[%c0_4, %c0_5] : memref<128x128xf32, #tpu.memory_space<vmem>>, vector<128x128xf32>
    %cst_6 = arith.constant dense<0.000000e+00> : vector<256x128xf32>
    %6 = tpu.matmul %4, %5, %cst_6 {dimension_numbers = #tpu.dot_dimension_numbers<[1], [0], [0], [1], [0, 0, 1, 1], [], []>} : vector<256x128xf32>, vector<128x128xf32>, vector<256x128xf32> -> vector<256x128xf32>
    %c0_7 = arith.constant 0 : index
    %c0_8 = arith.constant 0 : index
    %7 = vector.load %arg4[%c0_7, %c0_8] : memref<1x128xf32, #tpu.memory_space<vmem>>, vector<1x128xf32>
    %8 = vector.broadcast %7 : vector<1x128xf32> to vector<256x128xf32>
    %9 = arith.addf %6, %8 : vector<256x128xf32>
    %c0_9 = arith.constant 0 : index
    %c0_10 = arith.constant 0 : index
    %10 = vector.load %arg5[%c0_9, %c0_10] : memref<256x128xf32, #tpu.memory_space<vmem>>, vector<256x128xf32>
    tpu.vector_store %arg5[%c0_9, %c0_10], %9 {strides = array<i32>} : memref<256x128xf32, #tpu.memory_space<vmem>>, vector<256x128xf32>,
    return
  }
  func.func @transform_0(%arg0: i32) -> (i32, i32) {
    %c0_i32 = arith.constant 0 : i32
    %c0_i32_0 = arith.constant 0 : i32
    return %arg0, %c0_i32 : i32, i32
  }
  func.func @transform_1(%arg0: i32) -> (i32, i32) {
    %c0_i32 = arith.constant 0 : i32
    %c0_i32_0 = arith.constant 0 : i32
    %c0_i32_1 = arith.constant 0 : i32
    return %c0_i32, %c0_i32_0 : i32, i32
  }
  func.func @transform_2(%arg0: i32) -> (i32, i32) {
    %c0_i32 = arith.constant 0 : i32
    %c0_i32_0 = arith.constant 0 : i32
    %c0_i32_1 = arith.constant 0 : i32
    return %c0_i32, %c0_i32_0 : i32, i32
  }
  func.func @transform_3(%arg0: i32) -> (i32, i32) {
    %c0_i32 = arith.constant 0 : i32
    %c0_i32_0 = arith.constant 0 : i32
    %c0_i32_1 = arith.constant 0 : i32
    return %c0_i32, %c0_i32_0 : i32, i32
  }
  func.func @transform_4(%arg0: i32) -> (i32, i32) {
    %c0_i32 = arith.constant 0 : i32
    %c0_i32_0 = arith.constant 0 : i32
    return %arg0, %c0_i32 : i32, i32
  }
}

</mosaic_0001>

<bundles_post_ra>
// kernel: simple_1d_cnn.1
= control target key start
LH: loop header
LB: loop body
LE: loop exit
PB: predicated region body
PF: predicated region fallthrough
CT: control target
= control target key end

     0   :  { %s1143_s1 = inlined_call_operand.vmem [shape: f32[256,128], index: 1, kind: input, shape index: {}]   ;;  %s1144_s0 = inlined_call_operand.vmem [shape: f32[256,256], index: 0, kind: input, shape index: {}]   ;;  %s1145_s2 = inlined_call_operand.vmem [shape: f32[128,128], index: 2, kind: input, shape index: {}]   ;;  %s1146_s3 = inlined_call_operand.vmem [shape: f32[1,128], index: 3, kind: input, shape index: {}]   ;;  %s1147_s4 = inlined_call_operand.vmem [shape: f32[256,128], index: 4, kind: output, shape index: {}]  }
   0x1   :  { %v96_v0 = vld [vmem:[%s1143_s1 + $0x78] sm:$0xff]  ;;  %v95_v2 = vld [vmem:[%s1143_s1 + $0x70] sm:$0xff]  ;;  %v94_v4 = vld [vmem:[%s1143_s1 + $0x68] sm:$0xff] }
   0x2   :  { %v620_v1 = vld [vmem:[%s1143_s1 + $0xf8] sm:$0xff]  ;;  %113 = vmatpush.msra.mxu0 %v96_v0  ;;  %540 = vmatpush.msra.mxu3 %v96_v0  ;;  %v628_v3 = vld [vmem:[%s1143_s1 + $0xf0] sm:$0xff]  ;;  %v637_v5 = vld [vmem:[%s1143_s1 + $0xe8] sm:$0xff] }
   0x3   :  { %226 = vmatpush.msra.mxu1 %v620_v1  ;;  %v93_v6 = vld [vmem:[%s1143_s1 + $0x60] sm:$0xff]  ;;  %v92_v8 = vld [vmem:[%s1143_s1 + $0x58] sm:$0xff]  ;;  %v91_v10 = vld [vmem:[%s1143_s1 + $0x50] sm:$0xff] }
   0x4   :  { %114 = vmatpush.msra.mxu0 %v95_v2  ;;  %541 = vmatpush.msra.mxu3 %v95_v2  ;;  %v646_v7 = vld [vmem:[%s1143_s1 + $0xe0] sm:$0xff]  ;;  %v655_v9 = vld [vmem:[%s1143_s1 + $0xd8] sm:$0xff]  ;;  %v664_v11 = vld [vmem:[%s1143_s1 + $0xd0] sm:$0xff] }
   0x5   :  { %227 = vmatpush.msra.mxu1 %v628_v3  ;;  %v90_v12 = vld [vmem:[%s1143_s1 + $0x48] sm:$0xff]  ;;  %v89_v14 = vld [vmem:[%s1143_s1 + $0x40] sm:$0xff]  ;;  %v88_v16 = vld [vmem:[%s1143_s1 + $0x38] sm:$0xff] }
   0x6   :  { %115 = vmatpush.msra.mxu0 %v94_v4  ;;  %542 = vmatpush.msra.mxu3 %v94_v4  ;;  %v673_v13 = vld [vmem:[%s1143_s1 + $0xc8] sm:$0xff]  ;;  %v682_v15 = vld [vmem:[%s1143_s1 + $0xc0] sm:$0xff]  ;;  %v691_v17 = vld [vmem:[%s1143_s1 + $0xb8] sm:$0xff] }
   0x7   :  { %228 = vmatpush.msra.mxu1 %v637_v5  ;;  %v87_v18 = vld [vmem:[%s1143_s1 + $0x30] sm:$0xff]  ;;  %v86_v20 = vld [vmem:[%s1143_s1 + $0x28] sm:$0xff]  ;;  %v85_v22 = vld [vmem:[%s1143_s1 + $0x20] sm:$0xff] }
   0x8   :  { %116 = vmatpush.msra.mxu0 %v93_v6  ;;  %543 = vmatpush.msra.mxu3 %v93_v6  ;;  %v103_v19 = vld [vmem:[%s1143_s1 + $0xb0] sm:$0xff]  ;;  %v102_v21 = vld [vmem:[%s1143_s1 + $0xa8] sm:$0xff]  ;;  %v101_v23 = vld [vmem:[%s1143_s1 + $0xa0] sm:$0xff] }
   0x9   :  { %229 = vmatpush.msra.mxu1 %v646_v7  ;;  %v84_v24 = vld [vmem:[%s1143_s1 + $0x18] sm:$0xff]  ;;  %v83_v26 = vld [vmem:[%s1143_s1 + $0x10] sm:$0xff]  ;;  %v82_v28 = vld [vmem:[%s1143_s1 + $0x8] sm:$0xff] }
   0xa   :  { %117 = vmatpush.msra.mxu0 %v92_v8  ;;  %544 = vmatpush.msra.mxu3 %v92_v8  ;;  %v100_v25 = vld [vmem:[%s1143_s1 + $0x98] sm:$0xff]  ;;  %v99_v27 = vld [vmem:[%s1143_s1 + $0x90] sm:$0xff]  ;;  %v98_v29 = vld [vmem:[%s1143_s1 + $0x88] sm:$0xff] }
   0xb   :  { %230 = vmatpush.msra.mxu1 %v655_v9  ;;  %v81_v30 = vld [vmem:[%s1143_s1] sm:$0xff]  ;;  %v18_v34 = vld [vmem:[%s1144_s0 + $0x8] sm:$0xff]  ;;  %v19_v35 = vld [vmem:[%s1144_s0 + $0x10] sm:$0xff] }
   0xc   :  { %118 = vmatpush.msra.mxu0 %v91_v10  ;;  %545 = vmatpush.msra.mxu3 %v91_v10  ;;  %v97_v31 = vld [vmem:[%s1143_s1 + $0x80] sm:$0xff]  ;;  %v67_v36 = vld [vmem:[%s1144_s0 + $0x190] sm:$0xff]  ;;  %v20_v37 = vld [vmem:[%s1144_s0 + $0x18] sm:$0xff] }
   0xd   :  { %231 = vmatpush.msra.mxu1 %v664_v11  ;;  %v17_v32 = vld [vmem:[%s1144_s0] sm:$0xff]  ;;  %v22_v40 = vld [vmem:[%s1144_s0 + $0x28] sm:$0xff]  ;;  %v23_v41 = vld [vmem:[%s1144_s0 + $0x30] sm:$0xff] }
   0xe   :  { %119 = vmatpush.msra.mxu0 %v90_v12  ;;  %546 = vmatpush.msra.mxu3 %v90_v12  ;;  %v65_v33 = vld [vmem:[%s1144_s0 + $0x180] sm:$0xff]  ;;  %v71_v42 = vld [vmem:[%s1144_s0 + $0x1b0] sm:$0xff]  ;;  %v24_v43 = vld [vmem:[%s1144_s0 + $0x38] sm:$0xff] }
   0xf   :  { %232 = vmatpush.msra.mxu1 %v673_v13  ;;  %v21_v38 = vld [vmem:[%s1144_s0 + $0x20] sm:$0xff]  ;;  %v26_v46 = vld [vmem:[%s1144_s0 + $0x48] sm:$0xff]  ;;  %v27_v47 = vld [vmem:[%s1144_s0 + $0x50] sm:$0xff] }
  0x10   :  { %120 = vmatpush.msra.mxu0 %v89_v14  ;;  %547 = vmatpush.msra.mxu3 %v89_v14  ;;  %v69_v39 = vld [vmem:[%s1144_s0 + $0x1a0] sm:$0xff]  ;;  %v75_v48 = vld [vmem:[%s1144_s0 + $0x1d0] sm:$0xff]  ;;  %v28_v49 = vld [vmem:[%s1144_s0 + $0x58] sm:$0xff] }
  0x11   :  { %233 = vmatpush.msra.mxu1 %v682_v15  ;;  %v25_v44 = vld [vmem:[%s1144_s0 + $0x40] sm:$0xff]  ;;  %v30_v52 = vld [vmem:[%s1144_s0 + $0x68] sm:$0xff]  ;;  %v31_v53 = vld [vmem:[%s1144_s0 + $0x70] sm:$0xff] }
  0x12   :  { %121 = vmatpush.msra.mxu0 %v88_v16  ;;  %548 = vmatpush.msra.mxu3 %v88_v16  ;;  %v73_v45 = vld [vmem:[%s1144_s0 + $0x1c0] sm:$0xff]  ;;  %v79_v54 = vld [vmem:[%s1144_s0 + $0x1f0] sm:$0xff]  ;;  %v32_v55 = vld [vmem:[%s1144_s0 + $0x78] sm:$0xff] }
  0x13   :  { %234 = vmatpush.msra.mxu1 %v691_v17  ;;  %v29_v50 = vld [vmem:[%s1144_s0 + $0x60] sm:$0xff]  ;;  %v34_v57 = vld [vmem:[%s1144_s0 + $0x88] sm:$0xff]  ;;  %v386_v59 = vld [vmem:[%s1145_s2 + $0x78] sm:$0xff] }
  0x14   :  { %122 = vmatpush.msra.mxu0 %v87_v18  ;;  %549 = vmatpush.msra.mxu3 %v87_v18  ;;  %v77_v51 = vld [vmem:[%s1144_s0 + $0x1e0] sm:$0xff]  ;;  %v66_v58 = vld [vmem:[%s1144_s0 + $0x188] sm:$0xff]  ;;  %v385_v60 = vld [vmem:[%s1145_s2 + $0x70] sm:$0xff] }
  0x15   :  { %235 = vmatpush.msra.mxu1 %v103_v19  ;;  %v33_v56 = vld [vmem:[%s1144_s0 + $0x80] sm:$0xff]  ;;  %391 = vmatpush.msra.mxu2 %v386_v59  ;;  %v384_v61 = vld [vmem:[%s1145_s2 + $0x68] sm:$0xff]  ;;  %v35_v62 = vld [vmem:[%s1144_s0 + $0x90] sm:$0xff] }
  0x16   :  { %123 = vmatpush.msra.mxu0 %v86_v20  ;;  %550 = vmatpush.msra.mxu3 %v86_v20  ;;  %v36_v63 = vld [vmem:[%s1144_s0 + $0x98] sm:$0xff]  ;;  %v37_v4 = vld [vmem:[%s1144_s0 + $0xa0] sm:$0xff]  ;;  %v38_v6 = vld [vmem:[%s1144_s0 + $0xa8] sm:$0xff] }
  0x17   :  { %236 = vmatpush.msra.mxu1 %v102_v21  ;;  %392 = vmatpush.msra.mxu2 %v385_v60  ;;  %v68_v0 = vld [vmem:[%s1144_s0 + $0x198] sm:$0xff]  ;;  %v379_v8 = vld [vmem:[%s1145_s2 + $0x40] sm:$0xff]  ;;  %v377_v10 = vld [vmem:[%s1145_s2 + $0x30] sm:$0xff] }
  0x18   :  { %124 = vmatpush.msra.mxu0 %v85_v22  ;;  %551 = vmatpush.msra.mxu3 %v85_v22  ;;  %v382_v2 = vld [vmem:[%s1145_s2 + $0x58] sm:$0xff]  ;;  %v376_v12 = vld [vmem:[%s1145_s2 + $0x28] sm:$0xff]  ;;  %v373_v18 = vld [vmem:[%s1145_s2 + $0x10] sm:$0xff] }
  0x19   :  { %237 = vmatpush.msra.mxu1 %v101_v23  ;;  %393 = vmatpush.msra.mxu2 %v384_v61  ;;  %v72_v14 = vld [vmem:[%s1144_s0 + $0x1b8] sm:$0xff]  ;;  %v74_v20 = vld [vmem:[%s1144_s0 + $0x1c8] sm:$0xff]  ;;  %v371_v22 = vld [vmem:[%s1145_s2] sm:$0xff] }
  0x1a   :  { %125 = vmatpush.msra.mxu0 %v84_v24  ;;  %552 = vmatpush.msra.mxu3 %v84_v24  ;;  %v374_v16 = vld [vmem:[%s1145_s2 + $0x18] sm:$0xff] }
  0x1b   :  { %238 = vmatpush.msra.mxu1 %v100_v25  ;;  %v44_v24 = vld [vmem:[%s1144_s0 + $0xd8] sm:$0xff] }
  0x1c   :  { %126 = vmatpush.msra.mxu0 %v83_v26  ;;  %553 = vmatpush.msra.mxu3 %v83_v26  ;;  %v45_v26 = vld [vmem:[%s1144_s0 + $0xe0] sm:$0xff] }
  0x1d   :  { %239 = vmatpush.msra.mxu1 %v99_v27 }
  0x1e   :  { %127 = vmatpush.msra.mxu0 %v82_v28  ;;  %554 = vmatpush.msra.mxu3 %v82_v28  ;;  %v78_v28 = vld [vmem:[%s1144_s0 + $0x1e8] sm:$0xff] }
  0x1f   :  { %240 = vmatpush.msra.mxu1 %v98_v29 }
  0x20   :  { %128 = vmatpush.msra.mxu0 %v81_v30  ;;  %555 = vmatpush.msra.mxu3 %v81_v30  ;;  %v48_v30 = vld [vmem:[%s1144_s0 + $0xf8] sm:$0xff] }
  0x21   :  { %241 = vmatpush.msra.mxu1 %v97_v31  ;;  %129 = vmatmul.f32.vlgmr.msra.gmra.mxu0 %v17_v32 }
  0x22   :  { %201 = vmatmul.f32.vlgmr.msra.gmra.mxu3 %v65_v33  ;;  %242 = vmatmul.f32.vlgmr.msra.gmra.mxu1 %v18_v34  ;;  %v49_v33 = vld [vmem:[%s1144_s0 + $0x100] sm:$0xff] }
  0x23   :  { %556 = vmatpush.msrb.mxu3 %v620_v1  ;;  %v383_v1 = vld [vmem:[%s1145_s2 + $0x60] sm:$0xff] }
  0x24   :  { %394 = vmatpush.msra.mxu2 %v383_v1 }
  0x25   :  { %557 = vmatpush.msrb.mxu3 %v628_v3  ;;  %v381_v3 = vld [vmem:[%s1145_s2 + $0x50] sm:$0xff] }
  0x26   :  { %395 = vmatpush.msra.mxu2 %v382_v2 }
  0x27   :  { %558 = vmatpush.msrb.mxu3 %v637_v5  ;;  %v380_v5 = vld [vmem:[%s1145_s2 + $0x48] sm:$0xff] }
  0x28   :  { %396 = vmatpush.msra.mxu2 %v381_v3 }
  0x29   :  { %132 = vmatmul.f32.gmra.mxu0 %v19_v35  ;;  %559 = vmatpush.msrb.mxu3 %v646_v7  ;;  %v70_v7 = vld [vmem:[%s1144_s0 + $0x1a8] sm:$0xff] }
  0x2a   :  { %204 = vmatmul.f32.gmra.mxu3 %v67_v36  ;;  %245 = vmatmul.f32.gmra.mxu1 %v20_v37  ;;  %v50_v35 = vld [vmem:[%s1144_s0 + $0x108] sm:$0xff] }
  0x2b   :  { %560 = vmatpush.msrb.mxu3 %v655_v9  ;;  %397 = vmatpush.msra.mxu2 %v380_v5  ;;  %v378_v9 = vld [vmem:[%s1145_s2 + $0x38] sm:$0xff] }
  0x2d   :  { %561 = vmatpush.msrb.mxu3 %v664_v11  ;;  %398 = vmatpush.msra.mxu2 %v379_v8  ;;  %v39_v11 = vld [vmem:[%s1144_s0 + $0xb0] sm:$0xff] }
  0x2f   :  { %562 = vmatpush.msrb.mxu3 %v673_v13  ;;  %399 = vmatpush.msra.mxu2 %v378_v9  ;;  %v40_v13 = vld [vmem:[%s1144_s0 + $0xb8] sm:$0xff] }
  0x31   :  { %135 = vmatmul.f32.gmra.mxu0 %v21_v38  ;;  %563 = vmatpush.msrb.mxu3 %v682_v15  ;;  %v375_v15 = vld [vmem:[%s1145_s2 + $0x20] sm:$0xff] }
  0x32   :  { %207 = vmatmul.f32.gmra.mxu3 %v69_v39  ;;  %248 = vmatmul.f32.gmra.mxu1 %v22_v40  ;;  %v51_v40 = vld [vmem:[%s1144_s0 + $0x110] sm:$0xff] }
  0x33   :  { %564 = vmatpush.msrb.mxu3 %v691_v17  ;;  %400 = vmatpush.msra.mxu2 %v377_v10  ;;  %v41_v17 = vld [vmem:[%s1144_s0 + $0xc0] sm:$0xff] }
  0x35   :  { %565 = vmatpush.msrb.mxu3 %v103_v19  ;;  %401 = vmatpush.msra.mxu2 %v376_v12  ;;  %v42_v19 = vld [vmem:[%s1144_s0 + $0xc8] sm:$0xff] }
  0x37   :  { %566 = vmatpush.msrb.mxu3 %v102_v21  ;;  %402 = vmatpush.msra.mxu2 %v375_v15  ;;  %v372_v21 = vld [vmem:[%s1145_s2 + $0x8] sm:$0xff] }
  0x39   :  { %138 = vmatmul.f32.gmra.mxu0 %v23_v41  ;;  %567 = vmatpush.msrb.mxu3 %v101_v23  ;;  %v43_v23 = vld [vmem:[%s1144_s0 + $0xd0] sm:$0xff] }
  0x3a   :  { %210 = vmatmul.f32.gmra.mxu3 %v71_v42  ;;  %251 = vmatmul.f32.gmra.mxu1 %v24_v43  ;;  %v52_v42 = vld [vmem:[%s1144_s0 + $0x118] sm:$0xff] }
  0x3b   :  { %568 = vmatpush.msrb.mxu3 %v100_v25  ;;  %403 = vmatpush.msra.mxu2 %v374_v16  ;;  %v76_v25 = vld [vmem:[%s1144_s0 + $0x1d8] sm:$0xff] }
  0x3d   :  { %569 = vmatpush.msrb.mxu3 %v99_v27  ;;  %404 = vmatpush.msra.mxu2 %v373_v18  ;;  %v46_v27 = vld [vmem:[%s1144_s0 + $0xe8] sm:$0xff] }
  0x3f   :  { %570 = vmatpush.msrb.mxu3 %v98_v29  ;;  %405 = vmatpush.msra.mxu2 %v372_v21  ;;  %v47_v29 = vld [vmem:[%s1144_s0 + $0xf0] sm:$0xff] }
  0x41   :  { %141 = vmatmul.f32.gmra.mxu0 %v25_v44  ;;  %571 = vmatpush.msrb.mxu3 %v97_v31  ;;  %v80_v31 = vld [vmem:[%s1144_s0 + $0x1f8] sm:$0xff] }
  0x42   :  { %213 = vmatmul.f32.gmra.mxu3 %v73_v45  ;;  %254 = vmatmul.f32.gmra.mxu1 %v26_v46 }
  0x43   :  { %572 = vmatpush.msra.mxu3 %v386_v59  ;;  %406 = vmatpush.msra.mxu2 %v371_v22 }
  0x45   :  { %573 = vmatpush.msra.mxu3 %v385_v60 }
  0x47   :  { %574 = vmatpush.msra.mxu3 %v384_v61  ;;  %v57_v61 = vld [vmem:[%s1144_s0 + $0x140] sm:$0xff] }
  0x49   :  { %144 = vmatmul.f32.gmra.mxu0 %v27_v47  ;;  %575 = vmatpush.msra.mxu3 %v383_v1  ;;  %v53_v47 = vld [vmem:[%s1144_s0 + $0x120] sm:$0xff] }
  0x4a   :  { %216 = vmatmul.f32.gmra.mxu3 %v75_v48  ;;  %257 = vmatmul.f32.gmra.mxu1 %v28_v49  ;;  %v54_v49 = vld [vmem:[%s1144_s0 + $0x128] sm:$0xff] }
  0x4b   :  { %576 = vmatpush.msra.mxu3 %v382_v2 }
  0x4d   :  { %577 = vmatpush.msra.mxu3 %v381_v3 }
  0x4f   :  { %578 = vmatpush.msra.mxu3 %v380_v5 }
  0x51   :  { %147 = vmatmul.f32.gmra.mxu0 %v29_v50  ;;  %579 = vmatpush.msra.mxu3 %v379_v8 }
  0x52   :  { %219 = vmatmul.f32.gmra.mxu3 %v77_v51  ;;  %260 = vmatmul.f32.gmra.mxu1 %v30_v52 }
  0x53   :  { %580 = vmatpush.msra.mxu3 %v378_v9 }
  0x55   :  { %581 = vmatpush.msra.mxu3 %v377_v10 }
  0x57   :  { %582 = vmatpush.msra.mxu3 %v376_v12 }
  0x59   :  { %150 = vmatmul.f32.gmra.mxu0 %v31_v53  ;;  %583 = vmatpush.msra.mxu3 %v375_v15 }
  0x5a   :  { %222 = vmatmul.f32.gmra.mxu3 %v79_v54  ;;  %263 = vmatmul.f32.gmra.mxu1 %v32_v55  ;;  %v55_v54 = vld [vmem:[%s1144_s0 + $0x130] sm:$0xff] }
  0x5b   :  { %584 = vmatpush.msra.mxu3 %v374_v16 }
  0x5d   :  { %585 = vmatpush.msra.mxu3 %v373_v18  ;;  %v63_v18 = vld [vmem:[%s1144_s0 + $0x170] sm:$0xff] }
  0x5f   :  { %586 = vmatpush.msra.mxu3 %v372_v21 }
  0x61   :  { %153 = vmatmul.f32.gmra.mxu0 %v33_v56  ;;  %587 = vmatpush.msra.mxu3 %v371_v22  ;;  %v56_v56 = vld [vmem:[%s1144_s0 + $0x138] sm:$0xff] }
  0x62   :  { %266 = vmatmul.f32.gmra.mxu1 %v34_v57  ;;  %314 = vmatmul.f32.vlgmr.msrb.gmra.mxu3 %v66_v58 }
  0x69   :  { %156 = vmatmul.f32.gmra.mxu0 %v35_v62 }
  0x6a   :  { %269 = vmatmul.f32.gmra.mxu1 %v36_v63  ;;  %317 = vmatmul.f32.gmra.mxu3 %v68_v0  ;;  %v58_v63 = vld [vmem:[%s1144_s0 + $0x148] sm:$0xff] }
  0x71   :  { %159 = vmatmul.f32.gmra.mxu0 %v37_v4  ;;  %v59_v4 = vld [vmem:[%s1144_s0 + $0x150] sm:$0xff] }
  0x72   :  { %272 = vmatmul.f32.gmra.mxu1 %v38_v6  ;;  %320 = vmatmul.f32.gmra.mxu3 %v70_v7  ;;  %v60_v6 = vld [vmem:[%s1144_s0 + $0x158] sm:$0xff] }
  0x79   :  { %162 = vmatmul.f32.gmra.mxu0 %v39_v11  ;;  %v61_v11 = vld [vmem:[%s1144_s0 + $0x160] sm:$0xff] }
  0x7a   :  { %275 = vmatmul.f32.gmra.mxu1 %v40_v13  ;;  %323 = vmatmul.f32.gmra.mxu3 %v72_v14  ;;  %v62_v13 = vld [vmem:[%s1144_s0 + $0x168] sm:$0xff] }
  0x81   :  { %165 = vmatmul.f32.gmra.mxu0 %v41_v17 }
  0x82   :  { %278 = vmatmul.f32.gmra.mxu1 %v42_v19  ;;  %326 = vmatmul.f32.gmra.mxu3 %v74_v20  ;;  %v64_v20 = vld [vmem:[%s1144_s0 + $0x178] sm:$0xff] }
  0x89   :  { %168 = vmatmul.f32.gmra.mxu0 %v43_v23 }
  0x8a   :  { %281 = vmatmul.f32.gmra.mxu1 %v44_v24  ;;  %329 = vmatmul.f32.gmra.mxu3 %v76_v25 }
  0x91   :  { %171 = vmatmul.f32.gmra.mxu0 %v45_v26 }
  0x92   :  { %284 = vmatmul.f32.gmra.mxu1 %v46_v27  ;;  %332 = vmatmul.f32.gmra.mxu3 %v78_v28 }
  0x99   :  { %174 = vmatmul.f32.gmra.mxu0 %v47_v29 }
  0x9a   :  { %287 = vmatmul.f32.gmra.mxu1 %v48_v30  ;;  %335 = vmatmul.f32.gmra.mxu3 %v80_v31 }
  0x9e   :  { %v130_v32 = vpop.f32.mrf.mxu0 }
  0x9f   :  { %v243_v34 = vpop.f32.mrf.mxu1 }
  0xa0   :  { %v244_v36 = vadd.f32 %v243_v34, %v130_v32 }
  0xa1   :  { %177 = vmatmul.f32.gmra.mxu0 %v49_v33 }
  0xa2   :  { %v339_v37 = vmax.f32 %v244_v36, 0.0  ;;  %290 = vmatmul.f32.gmra.mxu1 %v50_v35 }
  0xa4   :  { %407 = vmatmul.f32.vlgmr.msra.gmra.mxu2 %v339_v37 }
  0xa5   :  { %v944_v38 = vpop.f32.mrf.mxu3 }
  0xa6   :  { %v133_v39 = vpop.f32.mrf.mxu0 }
  0xa7   :  { %v246_v41 = vpop.f32.mrf.mxu1 }
  0xa8   :  { %v247_v43 = vadd.f32 %v246_v41, %v133_v39 }
  0xa9   :  { %180 = vmatmul.f32.gmra.mxu0 %v51_v40 }
  0xaa   :  { %v340_v44 = vmax.f32 %v247_v43, 0.0  ;;  %293 = vmatmul.f32.gmra.mxu1 %v52_v42 }
  0xac   :  { %410 = vmatmul.f32.gmra.mxu2 %v340_v44 }
  0xad   :  { %v952_v45 = vpop.f32.mrf.mxu3 }
  0xae   :  { %v136_v46 = vpop.f32.mrf.mxu0 }
  0xaf   :  { %v249_v48 = vpop.f32.mrf.mxu1 }
  0xb0   :  { %v250_v50 = vadd.f32 %v249_v48, %v136_v46 }
  0xb1   :  { %183 = vmatmul.f32.gmra.mxu0 %v53_v47 }
  0xb2   :  { %v341_v51 = vmax.f32 %v250_v50, 0.0  ;;  %296 = vmatmul.f32.gmra.mxu1 %v54_v49 }
  0xb4   :  { %413 = vmatmul.f32.gmra.mxu2 %v341_v51 }
  0xb5   :  { %v960_v52 = vpop.f32.mrf.mxu3 }
  0xb6   :  { %v139_v53 = vpop.f32.mrf.mxu0 }
  0xb7   :  { %v252_v55 = vpop.f32.mrf.mxu1 }
  0xb8   :  { %v253_v57 = vadd.f32 %v252_v55, %v139_v53 }
  0xb9   :  { %186 = vmatmul.f32.gmra.mxu0 %v55_v54 }
  0xba   :  { %v342_v58 = vmax.f32 %v253_v57, 0.0  ;;  %299 = vmatmul.f32.gmra.mxu1 %v56_v56 }
  0xbc   :  { %416 = vmatmul.f32.gmra.mxu2 %v342_v58 }
  0xbd   :  { %v968_v59 = vpop.f32.mrf.mxu3 }
  0xbe   :  { %v142_v60 = vpop.f32.mrf.mxu0 }
  0xbf   :  { %v255_v62 = vpop.f32.mrf.mxu1 }
  0xc0   :  { %v256_v0 = vadd.f32 %v255_v62, %v142_v60 }
  0xc1   :  { %189 = vmatmul.f32.gmra.mxu0 %v57_v61 }
  0xc2   :  { %v343_v1 = vmax.f32 %v256_v0, 0.0  ;;  %302 = vmatmul.f32.gmra.mxu1 %v58_v63 }
  0xc4   :  { %419 = vmatmul.f32.gmra.mxu2 %v343_v1 }
  0xc5   :  { %v976_v2 = vpop.f32.mrf.mxu3 }
  0xc6   :  { %v145_v3 = vpop.f32.mrf.mxu0 }
  0xc7   :  { %v258_v5 = vpop.f32.mrf.mxu1 }
  0xc8   :  { %v259_v7 = vadd.f32 %v258_v5, %v145_v3 }
  0xc9   :  { %192 = vmatmul.f32.gmra.mxu0 %v59_v4 }
  0xca   :  { %v344_v8 = vmax.f32 %v259_v7, 0.0  ;;  %305 = vmatmul.f32.gmra.mxu1 %v60_v6 }
  0xcc   :  { %422 = vmatmul.f32.gmra.mxu2 %v344_v8 }
  0xcd   :  { %v984_v9 = vpop.f32.mrf.mxu3 }
  0xce   :  { %v148_v10 = vpop.f32.mrf.mxu0 }
  0xcf   :  { %v261_v12 = vpop.f32.mrf.mxu1 }
  0xd0   :  { %v262_v14 = vadd.f32 %v261_v12, %v148_v10 }
  0xd1   :  { %195 = vmatmul.f32.gmra.mxu0 %v61_v11 }
  0xd2   :  { %v345_v15 = vmax.f32 %v262_v14, 0.0  ;;  %308 = vmatmul.f32.gmra.mxu1 %v62_v13 }
  0xd4   :  { %425 = vmatmul.f32.gmra.mxu2 %v345_v15 }
  0xd5   :  { %v992_v16 = vpop.f32.mrf.mxu3 }
  0xd6   :  { %v151_v17 = vpop.f32.mrf.mxu0 }
  0xd7   :  { %v264_v19 = vpop.f32.mrf.mxu1 }
  0xd8   :  { %v265_v21 = vadd.f32 %v264_v19, %v151_v17 }
  0xd9   :  { %198 = vmatmul.f32.gmra.mxu0 %v63_v18 }
  0xda   :  { %v346_v22 = vmax.f32 %v265_v21, 0.0  ;;  %311 = vmatmul.f32.gmra.mxu1 %v64_v20 }
  0xdc   :  { %428 = vmatmul.f32.gmra.mxu2 %v346_v22 }
  0xdd   :  { %v1000_v23 = vpop.f32.mrf.mxu3 }
  0xde   :  { %v154_v24 = vpop.f32.mrf.mxu0 }
  0xdf   :  { %v267_v25 = vpop.f32.mrf.mxu1 }
  0xe0   :  { %v268_v26 = vadd.f32 %v267_v25, %v154_v24 }
  0xe2   :  { %v347_v27 = vmax.f32 %v268_v26, 0.0 }
  0xe4   :  { %431 = vmatmul.f32.gmra.mxu2 %v347_v27 }
  0xe5   :  { %v315_v28 = vpop.f32.mrf.mxu3 }
  0xe6   :  { %v316_v29 = vadd.f32 %v315_v28, %v944_v38  ;;  %v157_v30 = vpop.f32.mrf.mxu0 }
  0xe7   :  { %v270_v31 = vpop.f32.mrf.mxu1 }
  0xe8   :  { %v363_v32 = vmax.f32 %v316_v29, 0.0  ;;  %v271_v33 = vadd.f32 %v270_v31, %v157_v30 }
  0xea   :  { %v348_v34 = vmax.f32 %v271_v33, 0.0  ;;  %479 = vmatmul.f32.vlgmr.msra.gmra.mxu3 %v363_v32 }
  0xec   :  { %434 = vmatmul.f32.gmra.mxu2 %v348_v34 }
  0xed   :  { %v318_v35 = vpop.f32.mrf.mxu3 }
  0xee   :  { %v319_v36 = vadd.f32 %v318_v35, %v952_v45  ;;  %v160_v37 = vpop.f32.mrf.mxu0 }
  0xef   :  { %v273_v39 = vpop.f32.mrf.mxu1 }
  0xf0   :  { %v364_v40 = vmax.f32 %v319_v36, 0.0  ;;  %v274_v41 = vadd.f32 %v273_v39, %v160_v37 }
  0xf2   :  { %v349_v42 = vmax.f32 %v274_v41, 0.0  ;;  %482 = vmatmul.f32.gmra.mxu3 %v364_v40 }
  0xf4   :  { %437 = vmatmul.f32.gmra.mxu2 %v349_v42 }
  0xf5   :  { %v321_v43 = vpop.f32.mrf.mxu3 }
  0xf6   :  { %v322_v38 = vadd.f32 %v321_v43, %v960_v52  ;;  %v163_v44 = vpop.f32.mrf.mxu0 }
  0xf7   :  { %v276_v46 = vpop.f32.mrf.mxu1 }
  0xf8   :  { %v365_v47 = vmax.f32 %v322_v38, 0.0  ;;  %v277_v48 = vadd.f32 %v276_v46, %v163_v44 }
  0xfa   :  { %v350_v49 = vmax.f32 %v277_v48, 0.0  ;;  %485 = vmatmul.f32.gmra.mxu3 %v365_v47 }
  0xfc   :  { %440 = vmatmul.f32.gmra.mxu2 %v350_v49 }
  0xfd   :  { %v324_v50 = vpop.f32.mrf.mxu3 }
  0xfe   :  { %v325_v45 = vadd.f32 %v324_v50, %v968_v59  ;;  %v166_v51 = vpop.f32.mrf.mxu0 }
  0xff   :  { %v279_v53 = vpop.f32.mrf.mxu1 }
 0x100   :  { %v366_v54 = vmax.f32 %v325_v45, 0.0  ;;  %v280_v55 = vadd.f32 %v279_v53, %v166_v51 }
 0x102   :  { %v351_v56 = vmax.f32 %v280_v55, 0.0  ;;  %488 = vmatmul.f32.gmra.mxu3 %v366_v54 }
 0x104   :  { %443 = vmatmul.f32.gmra.mxu2 %v351_v56 }
 0x105   :  { %v327_v57 = vpop.f32.mrf.mxu3 }
 0x106   :  { %v328_v52 = vadd.f32 %v327_v57, %v976_v2  ;;  %v169_v58 = vpop.f32.mrf.mxu0 }
 0x107   :  { %v282_v60 = vpop.f32.mrf.mxu1 }
 0x108   :  { %v367_v61 = vmax.f32 %v328_v52, 0.0  ;;  %v283_v62 = vadd.f32 %v282_v60, %v169_v58 }
 0x10a   :  { %v352_v63 = vmax.f32 %v283_v62, 0.0  ;;  %491 = vmatmul.f32.gmra.mxu3 %v367_v61 }
 0x10c   :  { %446 = vmatmul.f32.gmra.mxu2 %v352_v63 }
 0x10d   :  { %v330_v0 = vpop.f32.mrf.mxu3 }
 0x10e   :  { %v331_v59 = vadd.f32 %v330_v0, %v984_v9  ;;  %v172_v1 = vpop.f32.mrf.mxu0 }
 0x10f   :  { %v285_v3 = vpop.f32.mrf.mxu1 }
 0x110   :  { %v368_v4 = vmax.f32 %v331_v59, 0.0  ;;  %v286_v5 = vadd.f32 %v285_v3, %v172_v1 }
 0x112   :  { %v353_v6 = vmax.f32 %v286_v5, 0.0  ;;  %494 = vmatmul.f32.gmra.mxu3 %v368_v4 }
 0x114   :  { %449 = vmatmul.f32.gmra.mxu2 %v353_v6 }
 0x115   :  { %v333_v7 = vpop.f32.mrf.mxu3 }
 0x116   :  { %v334_v2 = vadd.f32 %v333_v7, %v992_v16  ;;  %v175_v8 = vpop.f32.mrf.mxu0  ;;  %v1013_v16 = vld [vmem:[%s1146_s3] ss:$0 sm:$0xff] }
 0x117   :  { %v288_v10 = vpop.f32.mrf.mxu1 }
 0x118   :  { %v369_v11 = vmax.f32 %v334_v2, 0.0  ;;  %v289_v12 = vadd.f32 %v288_v10, %v175_v8 }
 0x11a   :  { %v354_v13 = vmax.f32 %v289_v12, 0.0  ;;  %497 = vmatmul.f32.gmra.mxu3 %v369_v11 }
 0x11c   :  { %452 = vmatmul.f32.gmra.mxu2 %v354_v13 }
 0x11d   :  { %v336_v14 = vpop.f32.mrf.mxu3 }
 0x11e   :  { %v337_v9 = vadd.f32 %v336_v14, %v1000_v23  ;;  %v178_v15 = vpop.f32.mrf.mxu0 }
 0x11f   :  { %v291_v17 = vpop.f32.mrf.mxu1 }
 0x120   :  { %v370_v18 = vmax.f32 %v337_v9, 0.0  ;;  %v292_v19 = vadd.f32 %v291_v17, %v178_v15 }
 0x122   :  { %v355_v20 = vmax.f32 %v292_v19, 0.0  ;;  %500 = vmatmul.f32.gmra.mxu3 %v370_v18 }
 0x124   :  { %455 = vmatmul.f32.gmra.mxu2 %v355_v20 }
 0x126   :  { %v181_v21 = vpop.f32.mrf.mxu0 }
 0x127   :  { %v294_v22 = vpop.f32.mrf.mxu1  ;;  %v408_v24 = vpop.f32.mrf.mxu2 }
 0x128   :  { %v295_v25 = vadd.f32 %v294_v22, %v181_v21  ;;  %v409_v26 = vadd.f32 %v1013_v16, %v408_v24 }
 0x12a   :  { %v356_v27 = vmax.f32 %v295_v25, 0.0  ;;  %504 = vst [vmem:[%s1147_s4] sm:$0xff] %v409_v26 }
 0x12c   :  { %458 = vmatmul.f32.gmra.mxu2 %v356_v27 }
 0x12e   :  { %v184_v23 = vpop.f32.mrf.mxu0 }
 0x12f   :  { %v297_v28 = vpop.f32.mrf.mxu1  ;;  %v411_v29 = vpop.f32.mrf.mxu2 }
 0x130   :  { %v298_v30 = vadd.f32 %v297_v28, %v184_v23  ;;  %v412_v31 = vadd.f32 %v1013_v16, %v411_v29 }
 0x132   :  { %v357_v32 = vmax.f32 %v298_v30, 0.0  ;;  %505 = vst [vmem:[%s1147_s4 + $0x8] sm:$0xff] %v412_v31 }
 0x134   :  { %461 = vmatmul.f32.gmra.mxu2 %v357_v32 }
 0x136   :  { %v187_v33 = vpop.f32.mrf.mxu0 }
 0x137   :  { %v300_v34 = vpop.f32.mrf.mxu1  ;;  %v414_v35 = vpop.f32.mrf.mxu2 }
 0x138   :  { %v301_v36 = vadd.f32 %v300_v34, %v187_v33  ;;  %v415_v37 = vadd.f32 %v1013_v16, %v414_v35 }
 0x13a   :  { %v358_v39 = vmax.f32 %v301_v36, 0.0  ;;  %506 = vst [vmem:[%s1147_s4 + $0x10] sm:$0xff] %v415_v37 }
 0x13c   :  { %464 = vmatmul.f32.gmra.mxu2 %v358_v39 }
 0x13e   :  { %v190_v40 = vpop.f32.mrf.mxu0 }
 0x13f   :  { %v303_v41 = vpop.f32.mrf.mxu1  ;;  %v417_v42 = vpop.f32.mrf.mxu2 }
 0x140   :  { %v304_v43 = vadd.f32 %v303_v41, %v190_v40  ;;  %v418_v38 = vadd.f32 %v1013_v16, %v417_v42 }
 0x142   :  { %v359_v44 = vmax.f32 %v304_v43, 0.0  ;;  %507 = vst [vmem:[%s1147_s4 + $0x18] sm:$0xff] %v418_v38 }
 0x144   :  { %467 = vmatmul.f32.gmra.mxu2 %v359_v44 }
 0x146   :  { %v193_v46 = vpop.f32.mrf.mxu0 }
 0x147   :  { %v306_v47 = vpop.f32.mrf.mxu1  ;;  %v420_v48 = vpop.f32.mrf.mxu2 }
 0x148   :  { %v307_v49 = vadd.f32 %v306_v47, %v193_v46  ;;  %v421_v50 = vadd.f32 %v1013_v16, %v420_v48 }
 0x14a   :  { %v360_v45 = vmax.f32 %v307_v49, 0.0  ;;  %508 = vst [vmem:[%s1147_s4 + $0x20] sm:$0xff] %v421_v50 }
 0x14c   :  { %470 = vmatmul.f32.gmra.mxu2 %v360_v45 }
 0x14e   :  { %v196_v51 = vpop.f32.mrf.mxu0 }
 0x14f   :  { %v309_v53 = vpop.f32.mrf.mxu1  ;;  %v423_v54 = vpop.f32.mrf.mxu2 }
 0x150   :  { %v310_v55 = vadd.f32 %v309_v53, %v196_v51  ;;  %v424_v56 = vadd.f32 %v1013_v16, %v423_v54 }
 0x152   :  { %v361_v57 = vmax.f32 %v310_v55, 0.0  ;;  %509 = vst [vmem:[%s1147_s4 + $0x28] sm:$0xff] %v424_v56 }
 0x154   :  { %473 = vmatmul.f32.gmra.mxu2 %v361_v57 }
 0x156   :  { %v199_v52 = vpop.f32.mrf.mxu0 }
 0x157   :  { %v312_v58 = vpop.f32.mrf.mxu1  ;;  %v426_v60 = vpop.f32.mrf.mxu2 }
 0x158   :  { %v313_v61 = vadd.f32 %v312_v58, %v199_v52  ;;  %v427_v62 = vadd.f32 %v1013_v16, %v426_v60 }
 0x15a   :  { %v362_v63 = vmax.f32 %v313_v61, 0.0  ;;  %510 = vst [vmem:[%s1147_s4 + $0x30] sm:$0xff] %v427_v62 }
 0x15c   :  { %476 = vmatmul.f32.gmra.mxu2 %v362_v63 }
 0x15f   :  { %v429_v0 = vpop.f32.mrf.mxu2 }
 0x160   :  { %v430_v59 = vadd.f32 %v1013_v16, %v429_v0 }
 0x162   :  { %511 = vst [vmem:[%s1147_s4 + $0x38] sm:$0xff] %v430_v59 }
 0x167   :  { %v432_v1 = vpop.f32.mrf.mxu2 }
 0x168   :  { %v433_v3 = vadd.f32 %v1013_v16, %v432_v1 }
 0x16a   :  { %512 = vst [vmem:[%s1147_s4 + $0x40] sm:$0xff] %v433_v3 }
 0x16d   :  { %v480_v4 = vpop.f32.mrf.mxu3 }
 0x16e   :  { %v481_v5 = vadd.f32 %v1013_v16, %v480_v4 }
 0x16f   :  { %v435_v6 = vpop.f32.mrf.mxu2 }
 0x170   :  { %528 = vst [vmem:[%s1147_s4 + $0xc0] sm:$0xff] %v481_v5  ;;  %v436_v7 = vadd.f32 %v1013_v16, %v435_v6 }
 0x172   :  { %513 = vst [vmem:[%s1147_s4 + $0x48] sm:$0xff] %v436_v7 }
 0x175   :  { %v483_v2 = vpop.f32.mrf.mxu3 }
 0x176   :  { %v484_v8 = vadd.f32 %v1013_v16, %v483_v2 }
 0x177   :  { %v438_v10 = vpop.f32.mrf.mxu2 }
 0x178   :  { %529 = vst [vmem:[%s1147_s4 + $0xc8] sm:$0xff] %v484_v8  ;;  %v439_v11 = vadd.f32 %v1013_v16, %v438_v10 }
 0x17a   :  { %514 = vst [vmem:[%s1147_s4 + $0x50] sm:$0xff] %v439_v11 }
 0x17d   :  { %v486_v12 = vpop.f32.mrf.mxu3 }
 0x17e   :  { %v487_v13 = vadd.f32 %v1013_v16, %v486_v12 }
 0x17f   :  { %v441_v14 = vpop.f32.mrf.mxu2 }
 0x180   :  { %530 = vst [vmem:[%s1147_s4 + $0xd0] sm:$0xff] %v487_v13  ;;  %v442_v9 = vadd.f32 %v1013_v16, %v441_v14 }
 0x182   :  { %515 = vst [vmem:[%s1147_s4 + $0x58] sm:$0xff] %v442_v9 }
 0x185   :  { %v489_v15 = vpop.f32.mrf.mxu3 }
 0x186   :  { %v490_v17 = vadd.f32 %v1013_v16, %v489_v15 }
 0x187   :  { %v444_v18 = vpop.f32.mrf.mxu2 }
 0x188   :  { %531 = vst [vmem:[%s1147_s4 + $0xd8] sm:$0xff] %v490_v17  ;;  %v445_v19 = vadd.f32 %v1013_v16, %v444_v18 }
 0x18a   :  { %516 = vst [vmem:[%s1147_s4 + $0x60] sm:$0xff] %v445_v19 }
 0x18d   :  { %v492_v20 = vpop.f32.mrf.mxu3 }
 0x18e   :  { %v493_v21 = vadd.f32 %v1013_v16, %v492_v20 }
 0x18f   :  { %v447_v22 = vpop.f32.mrf.mxu2 }
 0x190   :  { %532 = vst [vmem:[%s1147_s4 + $0xe0] sm:$0xff] %v493_v21  ;;  %v448_v24 = vadd.f32 %v1013_v16, %v447_v22 }
 0x192   :  { %517 = vst [vmem:[%s1147_s4 + $0x68] sm:$0xff] %v448_v24 }
 0x195   :  { %v495_v25 = vpop.f32.mrf.mxu3 }
 0x196   :  { %v496_v26 = vadd.f32 %v1013_v16, %v495_v25 }
 0x197   :  { %v450_v27 = vpop.f32.mrf.mxu2 }
 0x198   :  { %533 = vst [vmem:[%s1147_s4 + $0xe8] sm:$0xff] %v496_v26  ;;  %v451_v23 = vadd.f32 %v1013_v16, %v450_v27 }
 0x19a   :  { %518 = vst [vmem:[%s1147_s4 + $0x70] sm:$0xff] %v451_v23 }
 0x19d   :  { %v498_v28 = vpop.f32.mrf.mxu3 }
 0x19e   :  { %v499_v29 = vadd.f32 %v1013_v16, %v498_v28 }
 0x19f   :  { %v453_v30 = vpop.f32.mrf.mxu2 }
 0x1a0   :  { %534 = vst [vmem:[%s1147_s4 + $0xf0] sm:$0xff] %v499_v29  ;;  %v454_v31 = vadd.f32 %v1013_v16, %v453_v30 }
 0x1a2   :  { %519 = vst [vmem:[%s1147_s4 + $0x78] sm:$0xff] %v454_v31 }
 0x1a5   :  { %v501_v32 = vpop.f32.mrf.mxu3 }
 0x1a6   :  { %v502_v33 = vadd.f32 %v1013_v16, %v501_v32 }
 0x1a7   :  { %v456_v34 = vpop.f32.mrf.mxu2 }
 0x1a8   :  { %535 = vst [vmem:[%s1147_s4 + $0xf8] sm:$0xff] %v502_v33  ;;  %v457_v35 = vadd.f32 %v1013_v16, %v456_v34 }
 0x1aa   :  { %520 = vst [vmem:[%s1147_s4 + $0x80] sm:$0xff] %v457_v35 }
 0x1af   :  { %v459_v36 = vpop.f32.mrf.mxu2 }
 0x1b0   :  { %v460_v37 = vadd.f32 %v1013_v16, %v459_v36 }
 0x1b2   :  { %521 = vst [vmem:[%s1147_s4 + $0x88] sm:$0xff] %v460_v37 }
 0x1b7   :  { %v462_v39 = vpop.f32.mrf.mxu2 }
 0x1b8   :  { %v463_v40 = vadd.f32 %v1013_v16, %v462_v39 }
 0x1ba   :  { %522 = vst [vmem:[%s1147_s4 + $0x90] sm:$0xff] %v463_v40 }
 0x1bf   :  { %v465_v41 = vpop.f32.mrf.mxu2 }
 0x1c0   :  { %v466_v42 = vadd.f32 %v1013_v16, %v465_v41 }
 0x1c2   :  { %523 = vst [vmem:[%s1147_s4 + $0x98] sm:$0xff] %v466_v42 }
 0x1c7   :  { %v468_v43 = vpop.f32.mrf.mxu2 }
 0x1c8   :  { %v469_v38 = vadd.f32 %v1013_v16, %v468_v43 }
 0x1ca   :  { %524 = vst [vmem:[%s1147_s4 + $0xa0] sm:$0xff] %v469_v38 }
 0x1cf   :  { %v471_v44 = vpop.f32.mrf.mxu2 }
 0x1d0   :  { %v472_v46 = vadd.f32 %v1013_v16, %v471_v44 }
 0x1d2   :  { %525 = vst [vmem:[%s1147_s4 + $0xa8] sm:$0xff] %v472_v46 }
 0x1d7   :  { %v474_v47 = vpop.f32.mrf.mxu2 }
 0x1d8   :  { %v475_v48 = vadd.f32 %v1013_v16, %v474_v47 }
 0x1da   :  { %526 = vst [vmem:[%s1147_s4 + $0xb0] sm:$0xff] %v475_v48 }
 0x1df   :  { %v477_v49 = vpop.f32.mrf.mxu2 }
 0x1e0   :  { %v478_v50 = vadd.f32 %v1013_v16, %v477_v49 }
 0x1e2   :  { %527 = vst [vmem:[%s1147_s4 + $0xb8] sm:$0xff] %v478_v50 }

</bundles_post_ra>
